<compile_context>
chip_gen: v5e
topology: v5e:2x2
jax: 0.10.0
libtpu: 0.0.40
codegen_flags: <defaults>
</compile_context>

<pallas_src>
import functools

import jax
import jax.numpy as jnp
from jax.experimental import pallas as pl
from jax.experimental.pallas import tpu as pltpu


def _combinator_kernel(x_ref, w_ref, b_ref, out_ref, *, precision):
    # x_ref : (TB, M*F) native dtype       w_ref : (M*F, 2*M) in x.dtype
    # b_ref : (3,) f32 in SMEM = [attn_bias, backbone_bias, 1/temp]
    # out_ref: (TB, 1) f32
    m_modes = w_ref.shape[1] // 2

    # Single fused projection on the MXU: x is read exactly once, stays in its
    # native dtype (bf16 x bf16 native; f32 pinned to HIGHEST precision).
    p = jnp.dot(x_ref[...], w_ref[...],
                preferred_element_type=jnp.float32,
                precision=precision)                          # (TB, 2M) f32

    scores = p[:, :m_modes] + b_ref[0]                        # (TB, M)
    pb = p[:, m_modes:]                                       # (TB, M) = x_m . wb

    # softmax over modes, folded with the weighted sum:
    #   y = sum_m softmax(scores)_m * pb_m + bb
    s_max = jnp.max(scores, axis=-1, keepdims=True)
    e = jnp.exp(scores - s_max)
    denom = jnp.sum(e, axis=-1, keepdims=True)
    num = jnp.sum(e * pb, axis=-1, keepdims=True)

    y = (num / denom + b_ref[1]) * b_ref[2]                   # (TB, 1)
    out_ref[...] = jax.nn.sigmoid(y).astype(out_ref.dtype)


def _sublane_multiple(itemsize):
    # f32 -> 8, bf16 -> 16, int8/fp8 -> 32 (sub-32-bit dtypes pack sublanes)
    return {4: 8, 2: 16, 1: 32}.get(itemsize, 8)


def _pick_batch_tile(batch, mf, itemsize):
    """Derive the batch tile (rows per grid step) from a VMEM budget."""
    sub = _sublane_multiple(itemsize)

    # Pipeline-buffer budget: min(24 MiB, 3/8 of physical VMEM) so we stay
    # inside the 32 MiB scoped window on every generation (v7x: 64 MiB
    # physical, v5e/v6e: 128 MiB).
    budget = 24 * 1024 * 1024
    try:
        phys = pltpu.get_tpu_info().vmem_capacity_bytes
        budget = min(budget, (phys * 3) // 8)
    except Exception:
        pass  # interpret mode / older runtimes: keep the conservative cap

    # Per-row VMEM cost:
    #   2 * mf * itemsize   double-buffered x tile
    #   2 * 512             double-buffered (tb, 1) f32 out tile, lane-padded
    #   6 * 512             narrow f32 softmax temporaries (p/scores/pb/e/...),
    #                       each lane-padded to (8,128) tiles when spilled
    per_row = 2 * mf * itemsize + 2 * 512 + 6 * 512
    tb = max(sub, budget // per_row)

    # Megacore (v7x): keep >= 4 grid steps when that still leaves >= ~2 MiB
    # x tiles, so the "parallel" batch axis load-balances across both cores.
    min_eff_rows = max(sub, (2 * 1024 * 1024) // max(1, mf * itemsize))
    quarter = -(-batch // 4)
    if quarter >= min_eff_rows:
        tb = min(tb, quarter)
    return tb


def modality_attention_combinator(x, w_attn, b_attn, w_backbone, b_backbone,
                                  temp=None, block_b=None):
    """Fused forward of ModalityAttentionCombinator (weight_sharing=False,
    interval_type=None).

    x: (B, M, F) in its native dtype (f32/bf16). Weights in PyTorch Linear
    layout: (1, F) rows, (1,) biases. block_b optionally overrides the
    auto-derived batch tile (rows per grid step)."""
    batch, modes, feat = x.shape
    mf = modes * feat
    itemsize = x.dtype.itemsize
    sub = _sublane_multiple(itemsize)

    # --- pack the two Linear(F -> 1) weights into one block-diagonal (M*F, 2M)
    # matrix: columns [0:M) give per-mode attention scores (x_m . wa), columns
    # [M:2M) give per-mode backbone projections (x_m . wb).
    wa = w_attn.reshape(feat).astype(jnp.float32)
    wb = w_backbone.reshape(feat).astype(jnp.float32)
    eye = jnp.eye(modes, dtype=jnp.float32)                    # (M, M)
    w_scores = (eye[:, None, :] * wa[None, :, None]).reshape(mf, modes)
    w_pool = (eye[:, None, :] * wb[None, :, None]).reshape(mf, modes)
    # keep the packed weight in x's dtype -> no in-kernel upcast of x
    w_packed = jnp.concatenate([w_scores, w_pool], axis=1).astype(x.dtype)

    # --- scalars -> SMEM: [attn_bias, backbone_bias, 1/temp]
    inv_temp = (1.0 / float(temp)) if temp else 1.0            # mirrors `if temp:`
    bias = jnp.concatenate([
        b_attn.reshape(1).astype(jnp.float32),
        b_backbone.reshape(1).astype(jnp.float32),
        jnp.full((1,), inv_temp, dtype=jnp.float32),
    ])                                                         # (3,)

    # --- lane-dense slab, native dtype, NO padding copy (ragged grid instead)
    x2d = x.reshape(batch, mf)

    # --- batch tile selection
    tb = block_b if block_b is not None else _pick_batch_tile(batch, mf, itemsize)
    tb = max(1, min(int(tb), batch))
    if tb < batch:
        # non-full blocks must respect the dtype's sublane multiple
        tb = max(sub, (tb // sub) * sub)
    # (tb == batch => full-extent block, always legal)

    precision = (jax.lax.Precision.HIGHEST if x.dtype == jnp.float32
                 else jax.lax.Precision.DEFAULT)

    out = pl.pallas_call(
        functools.partial(_combinator_kernel, precision=precision),
        out_shape=jax.ShapeDtypeStruct((batch, 1), jnp.float32),
        grid=(pl.cdiv(batch, tb),),                            # ragged last block OK
        in_specs=[
            pl.BlockSpec((tb, mf), lambda i: (i, 0)),           # streamed x tiles
            pl.BlockSpec((mf, 2 * modes), lambda i: (0, 0)),    # resident weights
            pl.BlockSpec(memory_space=pltpu.MemorySpace.SMEM),  # scalar biases
        ],
        out_specs=pl.BlockSpec((tb, 1), lambda i: (i, 0)),
        compiler_params=pltpu.CompilerParams(
            dimension_semantics=("parallel",),
            vmem_limit_bytes=32 * 1024 * 1024,
        ),
    )(x2d, w_packed, bias)

    return out


def _reference(x, w_attn, b_attn, w_backbone, b_backbone, temp=None):
    hp = jax.lax.Precision.HIGHEST
    scores = jnp.einsum("bmf,f->bm", x, w_attn.reshape(-1), precision=hp)
    scores = scores + b_attn.reshape(())
    attn = jax.nn.softmax(scores, axis=-1)
    pooled = jnp.sum(attn[..., None] * x, axis=-2)
    y = jnp.einsum("bf,f->b", pooled, w_backbone.reshape(-1), precision=hp)[:, None]
    y = y + b_backbone.reshape(())
    if temp:
        y = y / temp
    return jax.nn.sigmoid(y)


if __name__ == "__main__":
    B, M, F = 20, 4, 32   # batch, modalities, mode_in_features

    key = jax.random.PRNGKey(0)
    kx, kwa, kba, kwb, kbb = jax.random.split(key, 5)

    x = jax.random.normal(kx, (B, M, F), dtype=jnp.float32)

    # deterministic "torch.nn.Linear"-style init: U(-1/sqrt(F), 1/sqrt(F))
    bound = float(F) ** -0.5
    w_attn = jax.random.uniform(kwa, (1, F), minval=-bound, maxval=bound)
    b_attn = jax.random.uniform(kba, (1,), minval=-bound, maxval=bound)
    w_backbone = jax.random.uniform(kwb, (1, F), minval=-bound, maxval=bound)
    b_backbone = jax.random.uniform(kbb, (1,), minval=-bound, maxval=bound)

    ref = _reference(x, w_attn, b_attn, w_backbone, b_backbone)

    # 1) auto-sized tile (single full-extent block for this tiny batch)
    out = jax.block_until_ready(
        modality_attention_combinator(x, w_attn, b_attn, w_backbone, b_backbone))
    assert out.shape == (B, 1)
    assert jnp.allclose(out, ref, atol=2e-5, rtol=2e-5), (out, ref)

    # 2) forced small tile: multi-step ragged grid (20 rows = 8 + 8 + partial 4)
    out_s = jax.block_until_ready(
        modality_attention_combinator(x, w_attn, b_attn, w_backbone, b_backbone,
                                      block_b=8))
    assert jnp.allclose(out_s, ref, atol=2e-5, rtol=2e-5), (out_s, ref)

    # 3) temp path (matches torch's `if temp: x = x / temp`)
    ref_t = _reference(x, w_attn, b_attn, w_backbone, b_backbone, temp=2.0)
    out_t = jax.block_until_ready(
        modality_attention_combinator(x, w_attn, b_attn, w_backbone, b_backbone,
                                      temp=2.0, block_b=8))
    assert jnp.allclose(out_t, ref_t, atol=2e-5, rtol=2e-5), (out_t, ref_t)

    print("KERNEL_OK")
</pallas_src>

<mosaic_0001>
module attributes {stable_mosaic.version = 11 : i64} {
  func.func @_combinator_kernel(%arg0: i32, %arg1: memref<20x128xf32, #tpu.memory_space<vmem>>, %arg2: memref<128x8xf32, #tpu.memory_space<vmem>>, %arg3: memref<3xf32, #tpu.memory_space<smem>>, %arg4: memref<20x1xf32, #tpu.memory_space<vmem>>) attributes {dimension_semantics = [#tpu.dimension_semantics<parallel>], iteration_bounds = array<i64: 1>, scalar_prefetch = 0 : i64, scratch_operands = 0 : i64, tpu.core_type = #tpu.core_type<tc>, window_params = [{transform_indices = @transform_0, window_bounds = array<i64: 20, 128>}, {pipeline_mode = #tpu.pipeline_mode<synchronous>, transform_indices = @transform_1, window_bounds = array<i64: 128, 8>}, {transform_indices = @transform_2, window_bounds = array<i64: 3>}, {transform_indices = @transform_3, window_bounds = array<i64: 20, 1>}]} {
    %c0 = arith.constant 0 : index
    %c0_0 = arith.constant 0 : index
    %0 = vector.load %arg1[%c0, %c0_0] : memref<20x128xf32, #tpu.memory_space<vmem>>, vector<20x128xf32>
    %c0_1 = arith.constant 0 : index
    %c0_2 = arith.constant 0 : index
    %1 = vector.load %arg2[%c0_1, %c0_2] : memref<128x8xf32, #tpu.memory_space<vmem>>, vector<128x8xf32>
    %cst = arith.constant dense<0.000000e+00> : vector<20x8xf32>
    %2 = tpu.matmul %0, %1, %cst {dimension_numbers = #tpu.dot_dimension_numbers<[1], [0], [0], [1], [0, 0, 1, 1], [], []>, precision = #tpu.contract_precision<fp32>} : vector<20x128xf32>, vector<128x8xf32>, vector<20x8xf32> -> vector<20x8xf32>
    %3 = vector.extract_strided_slice %2 {offsets = [0, 0], sizes = [20, 4], strides = [1, 1]} : vector<20x8xf32> to vector<20x4xf32>
    %c0_3 = arith.constant 0 : index
    %4 = memref.load %arg3[%c0_3] : memref<3xf32, #tpu.memory_space<smem>>
    %5 = vector.broadcast %4 : f32 to vector<20x4xf32>
    %6 = arith.addf %3, %5 : vector<20x4xf32>
    %7 = vector.extract_strided_slice %2 {offsets = [0, 4], sizes = [20, 4], strides = [1, 1]} : vector<20x8xf32> to vector<20x4xf32>
    %cst_4 = arith.constant dense<0xFF800000> : vector<20xf32>
    %8 = vector.multi_reduction <maximumf>, %6, %cst_4 [1] : vector<20x4xf32> to vector<20xf32>
    %9 = vector.shape_cast %8 : vector<20xf32> to vector<20x1xf32>
    %10 = vector.broadcast %9 : vector<20x1xf32> to vector<20x4xf32>
    %11 = arith.subf %6, %10 : vector<20x4xf32>
    %12 = math.exp %11 : vector<20x4xf32>
    %cst_5 = arith.constant dense<0.000000e+00> : vector<20xf32>
    %13 = vector.multi_reduction <add>, %12, %cst_5 [1] : vector<20x4xf32> to vector<20xf32>
    %14 = vector.shape_cast %13 : vector<20xf32> to vector<20x1xf32>
    %15 = arith.mulf %12, %7 : vector<20x4xf32>
    %cst_6 = arith.constant dense<0.000000e+00> : vector<20xf32>
    %16 = vector.multi_reduction <add>, %15, %cst_6 [1] : vector<20x4xf32> to vector<20xf32>
    %17 = vector.shape_cast %16 : vector<20xf32> to vector<20x1xf32>
    %18 = arith.divf %17, %14 : vector<20x1xf32>
    %c1 = arith.constant 1 : index
    %19 = memref.load %arg3[%c1] : memref<3xf32, #tpu.memory_space<smem>>
    %20 = vector.broadcast %19 : f32 to vector<20x1xf32>
    %21 = arith.addf %18, %20 : vector<20x1xf32>
    %c2 = arith.constant 2 : index
    %22 = memref.load %arg3[%c2] : memref<3xf32, #tpu.memory_space<smem>>
    %23 = vector.broadcast %22 : f32 to vector<20x1xf32>
    %24 = arith.mulf %21, %23 : vector<20x1xf32>
    %25 = arith.negf %24 : vector<20x1xf32>
    %26 = math.exp %25 : vector<20x1xf32>
    %cst_7 = arith.constant 1.000000e+00 : f32
    %27 = vector.broadcast %cst_7 : f32 to vector<20x1xf32>
    %28 = arith.addf %27, %26 : vector<20x1xf32>
    %29 = arith.divf %27, %28 : vector<20x1xf32>
    %c0_8 = arith.constant 0 : index
    %c0_9 = arith.constant 0 : index
    %30 = vector.load %arg4[%c0_8, %c0_9] : memref<20x1xf32, #tpu.memory_space<vmem>>, vector<20x1xf32>
    tpu.vector_store %arg4[%c0_8, %c0_9], %29 {strides = array<i32>} : memref<20x1xf32, #tpu.memory_space<vmem>>, vector<20x1xf32>,
    return
  }
  func.func @transform_0(%arg0: i32) -> (i32, i32) {
    %c0_i32 = arith.constant 0 : i32
    %c0_i32_0 = arith.constant 0 : i32
    return %arg0, %c0_i32 : i32, i32
  }
  func.func @transform_1(%arg0: i32) -> (i32, i32) {
    %c0_i32 = arith.constant 0 : i32
    %c0_i32_0 = arith.constant 0 : i32
    %c0_i32_1 = arith.constant 0 : i32
    return %c0_i32, %c0_i32_0 : i32, i32
  }
  func.func @transform_2(%arg0: i32) -> i32 {
    %c0_i32 = arith.constant 0 : i32
    %c0_i32_0 = arith.constant 0 : i32
    return %c0_i32 : i32
  }
  func.func @transform_3(%arg0: i32) -> (i32, i32) {
    %c0_i32 = arith.constant 0 : i32
    %c0_i32_0 = arith.constant 0 : i32
    return %arg0, %c0_i32 : i32, i32
  }
}

</mosaic_0001>

<bundles_post_ra>
// kernel: tpu_custom_call.1
= control target key start
LH: loop header
LB: loop body
LE: loop exit
PB: predicated region body
PF: predicated region fallthrough
CT: control target
= control target key end

     0   :  { %8 = vsyncpa [#allocation3], 0  ;;  %s706_s15 = smov [#allocation2]   ;;  %s1023_s0 = inlined_call_operand.vmem [shape: f32[20,128], index: 0, kind: input, shape index: {}]   ;;  %s1024_s1 = inlined_call_operand.vmem [shape: f32[128,8], index: 1, kind: input, shape index: {}]   ;;  %s1025_s2 = inlined_call_operand.vmem [shape: f32[3], index: 2, kind: input, shape index: {}]   ;;  %s1026_s3 = inlined_call_operand.vmem [shape: f32[20,1], index: 3, kind: output, shape index: {}]  }
   0x1   :  { %s18_s14 = sshll.u32 %s1025_s2, 4  ;;  %s19_s14 = int_to_ptr.vmem [resolvable:$true] %s18_s14 }
   0x2   :  { %21 = dma.vmem_to_smem %s19_s14, 16, %s706_s15, [#allocation3]  }
   0x3   :  { %704 = dma.done.wait [#allocation3], 16  }
   0x4   :  { %705 = vsyncadd [#allocation3], 4294967280 }
   0x5   :  { %26 = sfence }
   0x6   :  { %v45_v0 = vld [vmem:[%s1024_s1 + $0x78] sm:$0xff]  ;;  %v44_v1 = vld [vmem:[%s1024_s1 + $0x70] sm:$0xff]  ;;  %v43_v2 = vld [vmem:[%s1024_s1 + $0x68] sm:$0xff]  ;;  %vm454_vm0 = vcmask 31744   ;;  %s707_s24 = smov 124   ;;  %vm461_vm1 = vcmask 27648  }
   0x7   :  { %v740_v3 = vand.u32 4294901760, %v45_v0  ;;  %v742_v4 = vand.u32 4294901760, %v44_v1  ;;  %v744_v5 = vand.u32 4294901760, %v43_v2  ;;  %v42_v6 = vld [vmem:[%s1024_s1 + $0x60] sm:$0xff]  ;;  %v41_v7 = vld [vmem:[%s1024_s1 + $0x58] sm:$0xff]  ;;  %v40_v8 = vld [vmem:[%s1024_s1 + $0x50] sm:$0xff] }
   0x8   :  { %v755_v9 = vand.u32 4294901760, %v42_v6  ;;  %v757_v10 = vand.u32 4294901760, %v41_v7  ;;  %v759_v11 = vand.u32 4294901760, %v40_v8  ;;  %v39_v12 = vld [vmem:[%s1024_s1 + $0x48] sm:$0xff]  ;;  %v38_v13 = vld [vmem:[%s1024_s1 + $0x40] sm:$0xff]  ;;  %v37_v18 = vld [vmem:[%s1024_s1 + $0x38] sm:$0xff] }
   0x9   :  { %47 = vmatpush.msra.mxu0 %v740_v3  ;;  %v104_v14 = vsub.f32 %v45_v0, %v740_v3  ;;  %v110_v15 = vsub.f32 %v44_v1, %v742_v4  ;;  %277 = vmatpush.msra.mxu3 %v740_v3  ;;  %v116_v16 = vsub.f32 %v43_v2, %v744_v5  ;;  %v772_v17 = vand.u32 4294901760, %v39_v12  ;;  %v36_v26 = vld [vmem:[%s1024_s1 + $0x30] sm:$0xff]  ;;  %v35_v36 = vld [vmem:[%s1024_s1 + $0x28] sm:$0xff]  ;;  %v34_v42 = vld [vmem:[%s1024_s1 + $0x20] sm:$0xff]  ;;  %s629_s25 = sld [smem:[#allocation2 + $0x1]] }
   0xa   :  { %v122_v19 = vsub.f32 %v42_v6, %v755_v9  ;;  %v128_v20 = vsub.f32 %v41_v7, %v757_v10  ;;  %v779_v21 = vand.u32 4294901760, %v38_v13  ;;  %v134_v25 = vsub.f32 %v40_v8, %v759_v11  ;;  %v33_v48 = vld [vmem:[%s1024_s1 + $0x18] sm:$0xff]  ;;  %v32_v54 = vld [vmem:[%s1024_s1 + $0x10] sm:$0xff]  ;;  %v31_v60 = vld [vmem:[%s1024_s1 + $0x8] sm:$0xff]  ;;  %s630_s26 = sld [smem:[#allocation2 + $0x2]] }
   0xb   :  { %49 = vmatpush.msra.mxu0 %v742_v4  ;;  %214 = vmatpush.msra.mxu2 %v104_v14  ;;  %v782_v22 = vand.u32 4294901760, %v104_v14  ;;  %v784_v23 = vand.u32 4294901760, %v110_v15  ;;  %v786_v24 = vand.u32 4294901760, %v116_v16  ;;  %v140_v28 = vsub.f32 %v39_v12, %v772_v17  ;;  %v27_v2 = vld [vmem:[%s1023_s0] sm:$0xff] }
   0xc   :  { %279 = vmatpush.msra.mxu3 %v742_v4  ;;  %v793_v27 = vand.u32 4294901760, %v122_v19  ;;  %v796_v29 = vand.u32 4294901760, %v37_v18  ;;  %v802_v33 = vand.u32 4294901760, %v128_v20  ;;  %v146_v34 = vsub.f32 %v38_v13, %v779_v21  ;;  %v30_v13 = vld [vmem:[%s1024_s1] sm:$0xff] }
   0xd   :  { %51 = vmatpush.msra.mxu0 %v744_v5  ;;  %217 = vmatpush.msra.mxu2 %v110_v15  ;;  %v106_v30 = vsub.f32 %v104_v14, %v782_v22  ;;  %v112_v31 = vsub.f32 %v110_v15, %v784_v23  ;;  %v118_v32 = vsub.f32 %v116_v16, %v786_v24  ;;  %v806_v35 = vand.u32 4294901760, %v36_v26 }
   0xe   :  { %281 = vmatpush.msra.mxu3 %v744_v5  ;;  %v124_v39 = vsub.f32 %v122_v19, %v793_v27  ;;  %v813_v40 = vand.u32 4294901760, %v134_v25  ;;  %v816_v41 = vand.u32 4294901760, %v140_v28  ;;  %v130_v44 = vsub.f32 %v128_v20, %v802_v33 }
   0xf   :  { %53 = vmatpush.msra.mxu0 %v755_v9  ;;  %220 = vmatpush.msra.mxu2 %v116_v16  ;;  %v107_v37 = vand.u32 4294901760, %v106_v30  ;;  %v113_v38 = vand.u32 4294901760, %v112_v31  ;;  %v119_v43 = vand.u32 4294901760, %v118_v32  ;;  %v152_v45 = vsub.f32 %v37_v18, %v796_v29 }
  0x10   :  { %283 = vmatpush.msra.mxu3 %v755_v9  ;;  %v824_v46 = vand.u32 4294901760, %v35_v36  ;;  %v827_v47 = vand.u32 4294901760, %v146_v34  ;;  %v125_v49 = vand.u32 4294901760, %v124_v39  ;;  %v136_v50 = vsub.f32 %v134_v25, %v813_v40 }
  0x11   :  { %55 = vmatpush.msra.mxu0 %v757_v10  ;;  %108 = vmatpush.msra.mxu1 %v107_v37  ;;  %v158_v51 = vsub.f32 %v36_v26, %v806_v35  ;;  %v835_v52 = vand.u32 4294901760, %v34_v42  ;;  %v142_v53 = vsub.f32 %v140_v28, %v816_v41  ;;  %v131_v55 = vand.u32 4294901760, %v130_v44 }
  0x12   :  { %223 = vmatpush.msra.mxu2 %v122_v19  ;;  %285 = vmatpush.msra.mxu3 %v757_v10  ;;  %v164_v56 = vsub.f32 %v35_v36, %v824_v46  ;;  %v844_v57 = vand.u32 4294901760, %v33_v48  ;;  %v846_v58 = vand.u32 4294901760, %v152_v45  ;;  %v148_v59 = vsub.f32 %v146_v34, %v827_v47 }
  0x13   :  { %57 = vmatpush.msra.mxu0 %v759_v11  ;;  %114 = vmatpush.msra.mxu1 %v113_v38  ;;  %v137_v61 = vand.u32 4294901760, %v136_v50  ;;  %v170_v62 = vsub.f32 %v34_v42, %v835_v52  ;;  %v855_v63 = vand.u32 4294901760, %v32_v54  ;;  %v857_v0 = vand.u32 4294901760, %v158_v51 }
  0x14   :  { %226 = vmatpush.msra.mxu2 %v128_v20  ;;  %287 = vmatpush.msra.mxu3 %v759_v11  ;;  %v143_v1 = vand.u32 4294901760, %v142_v53  ;;  %v154_v6 = vsub.f32 %v152_v45, %v846_v58  ;;  %v176_v7 = vsub.f32 %v33_v48, %v844_v57  ;;  %v866_v8 = vand.u32 4294901760, %v31_v60  ;;  %v28_v48 = vld [vmem:[%s1023_s0 + $0x8] sm:$0xff] }
  0x15   :  { %59 = vmatpush.msra.mxu0 %v772_v17  ;;  %120 = vmatpush.msra.mxu1 %v119_v43  ;;  %v868_v12 = vand.u32 4294901760, %v164_v56  ;;  %v149_v14 = vand.u32 4294901760, %v148_v59  ;;  %v160_v15 = vsub.f32 %v158_v51, %v857_v0  ;;  %v182_v16 = vsub.f32 %v32_v54, %v855_v63 }
  0x16   :  { %229 = vmatpush.msra.mxu2 %v134_v25  ;;  %289 = vmatpush.msra.mxu3 %v772_v17  ;;  %v877_v18 = vand.u32 4294901760, %v170_v62  ;;  %v879_v19 = vand.u32 4294901760, %v27_v2  ;;  %v882_v20 = vand.u32 4294901760, %v30_v13  ;;  %v155_v25 = vand.u32 4294901760, %v154_v6 }
  0x17   :  { %61 = vmatpush.msra.mxu0 %v779_v21  ;;  %126 = vmatpush.msra.mxu1 %v125_v49  ;;  %v166_v26 = vsub.f32 %v164_v56, %v868_v12  ;;  %v887_v30 = vand.u32 4294901760, %v176_v7  ;;  %v161_v31 = vand.u32 4294901760, %v160_v15  ;;  %v916_v53 = vand.u32 4294901760, %v28_v48 }
  0x18   :  { %232 = vmatpush.msra.mxu2 %v140_v28  ;;  %291 = vmatpush.msra.mxu3 %v779_v21  ;;  %v188_v28 = vsub.f32 %v31_v60, %v866_v8  ;;  %v172_v32 = vsub.f32 %v170_v62, %v877_v18  ;;  %v895_v36 = vsub.f32 %v27_v2, %v879_v19 }
  0x19   :  { %63 = vmatpush.msra.mxu0 %v796_v29  ;;  %132 = vmatpush.msra.mxu1 %v131_v55  ;;  %v194_v37 = vsub.f32 %v30_v13, %v882_v20  ;;  %v167_v38 = vand.u32 4294901760, %v166_v26  ;;  %v178_v39 = vsub.f32 %v176_v7, %v887_v30  ;;  %v87_v60 = vsub.f32 %v28_v48, %v916_v53 }
  0x1a   :  { %235 = vmatpush.msra.mxu2 %v146_v34  ;;  %293 = vmatpush.msra.mxu3 %v796_v29  ;;  %v892_v34 = vand.u32 4294901760, %v182_v16  ;;  %v901_v42 = vand.u32 4294901760, %v188_v28  ;;  %v173_v43 = vand.u32 4294901760, %v172_v32 }
  0x1b   :  { %65 = vmatpush.msra.mxu0 %v806_v35  ;;  %138 = vmatpush.msra.mxu1 %v137_v61  ;;  %v911_v49 = vand.u32 4294901760, %v194_v37  ;;  %v179_v50 = vand.u32 4294901760, %v178_v39  ;;  %v88_v2 = vand.u32 4294901760, %v87_v60 }
  0x1c   :  { %238 = vmatpush.msra.mxu2 %v152_v45  ;;  %295 = vmatpush.msra.mxu3 %v806_v35  ;;  %v184_v44 = vsub.f32 %v182_v16, %v892_v34  ;;  %v80_v45 = vand.u32 4294901760, %v895_v36 }
  0x1d   :  { %67 = vmatpush.msra.mxu0 %v824_v46  ;;  %144 = vmatpush.msra.mxu1 %v143_v1  ;;  %v29_v1 = vld [vmem:[%s1023_s0 + $0x10] sm:$0xf]  ;;  %s449_s0 = sld [smem:[#allocation2]] }
  0x1e   :  { %241 = vmatpush.msra.mxu2 %v158_v51  ;;  %297 = vmatpush.msra.mxu3 %v824_v46  ;;  %v190_v51 = vsub.f32 %v188_v28, %v901_v42  ;;  %v185_v54 = vand.u32 4294901760, %v184_v44  ;;  %v81_v55 = vsub.f32 %v895_v36, %v80_v45 }
  0x1f   :  { %69 = vmatpush.msra.mxu0 %v835_v52  ;;  %150 = vmatpush.msra.mxu1 %v149_v14 }
  0x20   :  { %244 = vmatpush.msra.mxu2 %v164_v56  ;;  %299 = vmatpush.msra.mxu3 %v835_v52  ;;  %v196_v56 = vsub.f32 %v194_v37, %v911_v49  ;;  %v191_v59 = vand.u32 4294901760, %v190_v51  ;;  %v82_v61 = vand.u32 4294901760, %v81_v55 }
  0x21   :  { %71 = vmatpush.msra.mxu0 %v844_v57  ;;  %156 = vmatpush.msra.mxu1 %v155_v25 }
  0x22   :  { %247 = vmatpush.msra.mxu2 %v170_v62  ;;  %301 = vmatpush.msra.mxu3 %v844_v57  ;;  %v197_v62 = vand.u32 4294901760, %v196_v56 }
  0x23   :  { %73 = vmatpush.msra.mxu0 %v855_v63  ;;  %162 = vmatpush.msra.mxu1 %v161_v31  ;;  %v450_v15 = vstv %s449_s0 }
  0x24   :  { %250 = vmatpush.msra.mxu2 %v176_v7  ;;  %303 = vmatpush.msra.mxu3 %v855_v63 }
  0x25   :  { %75 = vmatpush.msra.mxu0 %v866_v8  ;;  %168 = vmatpush.msra.mxu1 %v167_v38 }
  0x26   :  { %253 = vmatpush.msra.mxu2 %v182_v16  ;;  %305 = vmatpush.msra.mxu3 %v866_v8 }
  0x27   :  { %77 = vmatpush.msra.mxu0 %v882_v20  ;;  %174 = vmatpush.msra.mxu1 %v173_v43 }
  0x28   :  { %256 = vmatpush.msra.mxu2 %v188_v28  ;;  %307 = vmatpush.msra.mxu3 %v882_v20 }
  0x29   :  { %330 = vmatpush.msrb.mxu0 %v782_v22  ;;  %180 = vmatpush.msra.mxu1 %v179_v50 }
  0x2a   :  { %259 = vmatpush.msra.mxu2 %v194_v37  ;;  %650 = vmatpush.msrb.mxu3 %v740_v3 }
  0x2b   :  { %334 = vmatpush.msrb.mxu0 %v784_v23  ;;  %186 = vmatpush.msra.mxu1 %v185_v54 }
  0x2c   :  { %634 = vmatpush.msrb.mxu2 %v782_v22  ;;  %651 = vmatpush.msrb.mxu3 %v742_v4  ;;  %v936_v22 = vand.u32 4294901760, %v29_v1 }
  0x2d   :  { %338 = vmatpush.msrb.mxu0 %v786_v24  ;;  %192 = vmatpush.msra.mxu1 %v191_v59 }
  0x2e   :  { %635 = vmatpush.msrb.mxu2 %v784_v23  ;;  %83 = vmatmul.f32.vlgmr.msra.gmra.mxu0 %v82_v61  ;;  %v89_v23 = vsub.f32 %v87_v60, %v88_v2 }
  0x2f   :  { %342 = vmatpush.msrb.mxu0 %v793_v27  ;;  %198 = vmatpush.msra.mxu1 %v197_v62 }
  0x30   :  { %636 = vmatpush.msrb.mxu2 %v786_v24  ;;  %652 = vmatpush.msrb.mxu3 %v744_v5  ;;  %v95_v24 = vsub.f32 %v29_v1, %v936_v22 }
  0x31   :  { %346 = vmatpush.msrb.mxu0 %v802_v33  ;;  %405 = vmatpush.msrb.mxu1 %v740_v3  ;;  %v90_v3 = vand.u32 4294901760, %v89_v23 }
  0x32   :  { %637 = vmatpush.msrb.mxu2 %v793_v27  ;;  %653 = vmatpush.msrb.mxu3 %v755_v9 }
  0x33   :  { %262 = vmatmul.f32.vlgmr.msra.gmra.mxu2 %v895_v36  ;;  %350 = vmatpush.msrb.mxu0 %v813_v40 }
  0x34   :  { %638 = vmatpush.msrb.mxu2 %v802_v33  ;;  %407 = vmatpush.msrb.mxu1 %v742_v4  ;;  %v96_v4 = vand.u32 4294901760, %v95_v24 }
  0x35   :  { %311 = vmatmul.f32.vlgmr.msra.gmra.mxu3 %v80_v45  ;;  %354 = vmatpush.msrb.mxu0 %v816_v41 }
  0x36   :  { %639 = vmatpush.msrb.mxu2 %v813_v40  ;;  %409 = vmatpush.msrb.mxu1 %v744_v5  ;;  %v97_v5 = vsub.f32 %v95_v24, %v96_v4 }
  0x37   :  { %654 = vmatpush.msrb.mxu3 %v757_v10  ;;  %200 = vmatmul.f32.vlgmr.msra.gmra.mxu1 %v879_v19 }
  0x38   :  { %640 = vmatpush.msrb.mxu2 %v816_v41  ;;  %358 = vmatpush.msrb.mxu0 %v827_v47 }
  0x39   :  { %411 = vmatpush.msrb.mxu1 %v755_v9  ;;  %655 = vmatpush.msrb.mxu3 %v759_v11  ;;  %v98_v9 = vand.u32 4294901760, %v97_v5 }
  0x3a   :  { %91 = vmatmul.f32.gmra.mxu0 %v90_v3  ;;  %641 = vmatpush.msrb.mxu2 %v827_v47 }
  0x3b   :  { %362 = vmatpush.msrb.mxu0 %v846_v58  ;;  %413 = vmatpush.msrb.mxu1 %v757_v10 }
  0x3c   :  { %656 = vmatpush.msrb.mxu3 %v772_v17  ;;  %267 = vmatmul.f32.gmra.mxu2 %v87_v60 }
  0x3d   :  { %642 = vmatpush.msrb.mxu2 %v846_v58  ;;  %366 = vmatpush.msrb.mxu0 %v857_v0 }
  0x3e   :  { %415 = vmatpush.msrb.mxu1 %v759_v11  ;;  %657 = vmatpush.msrb.mxu3 %v779_v21 }
  0x3f   :  { %317 = vmatmul.f32.gmra.mxu3 %v88_v2  ;;  %643 = vmatpush.msrb.mxu2 %v857_v0 }
  0x40   :  { %370 = vmatpush.msrb.mxu0 %v868_v12  ;;  %417 = vmatpush.msrb.mxu1 %v772_v17 }
  0x41   :  { %658 = vmatpush.msrb.mxu3 %v796_v29  ;;  %204 = vmatmul.f32.gmra.mxu1 %v916_v53 }
  0x42   :  { %644 = vmatpush.msrb.mxu2 %v868_v12  ;;  %374 = vmatpush.msrb.mxu0 %v877_v18 }
  0x43   :  { %419 = vmatpush.msrb.mxu1 %v779_v21  ;;  %659 = vmatpush.msrb.mxu3 %v806_v35 }
  0x44   :  { %99 = vmatmul.f32.gmra.mxu0 %v98_v9  ;;  %645 = vmatpush.msrb.mxu2 %v877_v18 }
  0x45   :  { %378 = vmatpush.msrb.mxu0 %v887_v30  ;;  %421 = vmatpush.msrb.mxu1 %v796_v29 }
  0x46   :  { %660 = vmatpush.msrb.mxu3 %v824_v46  ;;  %272 = vmatmul.f32.gmra.mxu2 %v95_v24 }
  0x47   :  { %646 = vmatpush.msrb.mxu2 %v887_v30  ;;  %382 = vmatpush.msrb.mxu0 %v892_v34 }
  0x48   :  { %423 = vmatpush.msrb.mxu1 %v806_v35  ;;  %661 = vmatpush.msrb.mxu3 %v835_v52 }
  0x49   :  { %323 = vmatmul.f32.gmra.mxu3 %v96_v4  ;;  %647 = vmatpush.msrb.mxu2 %v892_v34 }
  0x4a   :  { %386 = vmatpush.msrb.mxu0 %v901_v42  ;;  %425 = vmatpush.msrb.mxu1 %v824_v46 }
  0x4b   :  { %662 = vmatpush.msrb.mxu3 %v844_v57  ;;  %208 = vmatmul.f32.gmra.mxu1 %v936_v22 }
  0x4c   :  { %648 = vmatpush.msrb.mxu2 %v901_v42  ;;  %390 = vmatpush.msrb.mxu0 %v911_v49 }
  0x4d   :  { %427 = vmatpush.msrb.mxu1 %v835_v52  ;;  %663 = vmatpush.msrb.mxu3 %v855_v63 }
  0x4e   :  { %392 = vmatmul.f32.vlgmr.msrb.gmra.mxu0 %v879_v19  ;;  %649 = vmatpush.msrb.mxu2 %v911_v49 }
  0x4f   :  { %429 = vmatpush.msrb.mxu1 %v844_v57  ;;  %664 = vmatpush.msrb.mxu3 %v866_v8 }
  0x50   :  { %396 = vmatmul.f32.vlgmr.msrb.gmra.mxu2 %v916_v53 }
  0x51   :  { %431 = vmatpush.msrb.mxu1 %v855_v63  ;;  %665 = vmatpush.msrb.mxu3 %v882_v20 }
  0x52   :  { %441 = vmatmul.f32.vlgmr.msrb.gmra.mxu3 %v916_v53 }
  0x53   :  { %433 = vmatpush.msrb.mxu1 %v866_v8 }
  0x55   :  { %435 = vmatpush.msrb.mxu1 %v882_v20 }
  0x56   :  { %437 = vmatmul.f32.vlgmr.msrb.gmra.mxu1 %v879_v19 }
  0x58   :  { %400 = vmatmul.f32.gmra.mxu2 %v936_v22 }
  0x5a   :  { %445 = vmatmul.f32.gmra.mxu3 %v936_v22 }
  0xab   :  { %v84_v10 = vpop.f32.mrf.mxu0 }
  0xb4   :  { %v201_v17 = vpop.f32.mrf.mxu1 }
  0xb5   :  { %v202_v41 = vadd.f32 %v201_v17, %v84_v10 }
  0xb6   :  { %v263_v11 = vpop.f32.mrf.mxu2 }
  0xb7   :  { %v92_v27 = vpop.f32.mrf.mxu0  ;;  %v264_v57 = vadd.f32 %v263_v11, %v202_v41 }
  0xb8   :  { %v312_v21 = vpop.f32.mrf.mxu3 }
  0xb9   :  { %v313_v6 = vadd.f32 %v312_v21, %v264_v57 }
  0xbe   :  { %v205_v33 = vpop.f32.mrf.mxu1 }
  0xbf   :  { %v268_v29 = vpop.f32.mrf.mxu2  ;;  %v206_v47 = vadd.f32 %v205_v33, %v92_v27 }
  0xc1   :  { %v100_v40 = vpop.f32.mrf.mxu0  ;;  %v269_v63 = vadd.f32 %v268_v29, %v206_v47 }
  0xc2   :  { %v318_v35 = vpop.f32.mrf.mxu3 }
  0xc3   :  { %v319_v7 = vadd.f32 %v318_v35, %v269_v63 }
  0xc8   :  { %v209_v52 = vpop.f32.mrf.mxu1 }
  0xc9   :  { %v273_v46 = vpop.f32.mrf.mxu2  ;;  %v210_v8 = vadd.f32 %v209_v52, %v100_v40 }
  0xcb   :  { %v393_v0 = vpop.f32.mrf.mxu0  ;;  %v274_v20 = vadd.f32 %v273_v46, %v210_v8 }
  0xcc   :  { %v324_v58 = vpop.f32.mrf.mxu3  ;;  %v394_v12 = vadd.f32 %v393_v0, %v313_v6 }
  0xcd   :  { %v325_v30 = vadd.f32 %v324_v58, %v274_v20 }
  0xd3   :  { %v397_v13 = vpop.f32.mrf.mxu2  ;;  %v438_v14 = vpop.f32.mrf.mxu1 }
  0xd4   :  { %v398_v16 = vadd.f32 %v397_v13, %v319_v7  ;;  %v439_v18 = vadd.f32 %v438_v14, %v394_v12 }
  0xd5   :  { %v442_v19 = vpop.f32.mrf.mxu3 }
  0xd6   :  { %v443_v25 = vadd.f32 %v442_v19, %v398_v16  ;;  %v451_v26 = vadd.f32 %v450_v15, %v439_v18  ;;  %v553_v19 = vstv %s629_s25 }
  0xd8   :  { %488 = vrot.lane.b32.xlu2 %v443_v25, %s707_s24  ;;  %v455_v28 = vsel %vm454_vm0, %v451_v26, -inf  ;;  %v452_v34 = vadd.f32 %v450_v15, %v443_v25 }
  0xd9   :  { %456 = vmax.xlane.f32.xlu0 %v455_v28 }
  0xda   :  { %v458_v38 = vsel %vm454_vm0, %v452_v34, -inf }
  0xdb   :  { %v401_v31 = vpop.f32.mrf.mxu2 }
  0xdc   :  { %v402_v32 = vadd.f32 %v401_v31, %v325_v30 }
  0xdd   :  { %v446_v36 = vpop.f32.mrf.mxu3 }
  0xde   :  { %v447_v37 = vadd.f32 %v446_v36, %v402_v32  ;;  %v558_v32 = vstv %s630_s26 }
  0xe0   :  { %490 = vrot.lane.b32.xlu2 %v447_v37, %s707_s24  ;;  %v453_v39 = vadd.f32 %v450_v15, %v447_v37 }
  0xe1   :  { %459 = vmax.xlane.f32.xlu0 %v458_v38 }
  0xe2   :  { %v462_v42 = vsel %vm461_vm1, %v453_v39, -inf }
  0xe3   :  { %463 = vmax.xlane.f32.xlu1 %v462_v42 }
  0xfc   :  { %486 = vrot.lane.b32.xlu1 %v439_v18, %s707_s24 }
 0x132   :  { %v489_v60 = vpop.permute.xlu2 %488 }
 0x13a   :  { %v491_v4 = vpop.permute.xlu2 %490 }
 0x14c   :  { %v457_v43 = vpop.xlane.xlu0 %456 }
 0x14d   :  { %v465_v44 = vsub.f32 %v451_v26, %v457_v43 }
 0x14f   :  { %v468_v45 = vmul.f32 1.442695, %v465_v44 }
 0x151   :  { %668 = vpow2.f32 %v468_v45 }
 0x154   :  { %v460_v48 = vpop.xlane.xlu0 %459 }
 0x155   :  { %v466_v49 = vsub.f32 %v452_v34, %v460_v48 }
 0x156   :  { %v464_v50 = vpop.xlane.xlu1 %463 }
 0x157   :  { %v669_v51 = vpop.eup %668  ;;  %v470_v53 = vmul.f32 1.442695, %v466_v49  ;;  %v467_v54 = vsub.f32 %v453_v39, %v464_v50 }
 0x158   :  { %v474_v55 = vsel %vm454_vm0, %v669_v51, 0.0 }
 0x159   :  { %670 = vpow2.f32 %v470_v53  ;;  %v472_v56 = vmul.f32 1.442695, %v467_v54  ;;  %475 = vadd.xlane.f32.xlu0 %v474_v55 }
 0x15b   :  { %672 = vpow2.f32 %v472_v56 }
 0x15f   :  { %v671_v59 = vpop.eup %670 }
 0x160   :  { %v477_v61 = vsel %vm454_vm0, %v671_v59, 0.0  ;;  %v496_v62 = vmul.f32 %v671_v59, %v489_v60 }
 0x161   :  { %v673_v1 = vpop.eup %672  ;;  %478 = vadd.xlane.f32.xlu2 %v477_v61 }
 0x162   :  { %v501_v2 = vsel %vm454_vm0, %v496_v62, 0.0  ;;  %v480_v22 = vsel %vm461_vm1, %v673_v1, 0.0  ;;  %v497_v5 = vmul.f32 %v673_v1, %v491_v4 }
 0x163   :  { %502 = vadd.xlane.f32.xlu1 %v501_v2  ;;  %481 = vadd.xlane.f32.xlu0 %v480_v22 }
 0x164   :  { %v504_v9 = vsel %vm461_vm1, %v497_v5, 0.0  ;;  %vm619_vm1 = vcmask 7168  }
 0x16e   :  { %v487_v23 = vpop.permute.xlu1 %486 }
 0x16f   :  { %v495_v24 = vmul.f32 %v669_v51, %v487_v23 }
 0x171   :  { %v498_v3 = vsel %vm454_vm0, %v495_v24, 0.0 }
 0x172   :  { %499 = vadd.xlane.f32.xlu0 %v498_v3 }
 0x17a   :  { %505 = vadd.xlane.f32.xlu0 %v504_v9 }
 0x1cc   :  { %v476_v10 = vpop.xlane.xlu0 %475 }
 0x1cd   :  { %674 = vrcp.f32 %v476_v10  ;;  %vm512_vm3 = vweird.f32 %v476_v10  ;;  %v516_v58 = vand.u32 2147483647, %v476_v10  ;;  %v518_v63 = vand.u32 2147483648, %v476_v10 }
 0x1cf   :  { %v519_v15 = vor.u32 1.1754944e-38, %v518_v63  ;;  %vm517_vm9 = vcmp.eq.f32.partialorder %v516_v58, 8.507059e+37 }
 0x1d3   :  { %v675_v11 = vpop.eup %674 }
 0x1d4   :  { %v508_v17 = vmul.f32 %v675_v11, %v476_v10  ;;  %v479_v21 = vpop.xlane.xlu2 %478  ;;  %vm513_vm2 = vweird.f32 %v675_v11 }
 0x1d5   :  { %676 = vrcp.f32 %v479_v21  ;;  %v533_v57 = vand.u32 2147483648, %v479_v21  ;;  %v531_v7 = vand.u32 2147483647, %v479_v21  ;;  %vm514_vm5 = vmor %vm512_vm3, %vm513_vm2  ;;  %vm527_vm6 = vweird.f32 %v479_v21 }
 0x1d6   :  { %v509_v27 = vsub.f32 1.0, %v508_v17  ;;  %v482_v29 = vpop.xlane.xlu0 %481  ;;  %v503_v20 = vpop.xlane.xlu1 %502 }
 0x1d7   :  { %678 = vrcp.f32 %v482_v29  ;;  %v534_v14 = vor.u32 1.1754944e-38, %v533_v57  ;;  %vm532_vm8 = vcmp.eq.f32.partialorder %v531_v7, 8.507059e+37  ;;  %v548_v34 = vand.u32 2147483648, %v482_v29 }
 0x1d8   :  { %v510_v33 = vmul.f32 %v675_v11, %v509_v27  ;;  %vm542_vm11 = vweird.f32 %v482_v29  ;;  %v546_v38 = vand.u32 2147483647, %v482_v29 }
 0x1d9   :  { %v549_v44 = vor.u32 1.1754944e-38, %v548_v34 }
 0x1da   :  { %v511_v52 = vadd.f32 %v675_v11, %v510_v33  ;;  %vm547_vm13 = vcmp.eq.f32.partialorder %v546_v38, 8.507059e+37 }
 0x1db   :  { %v677_v35 = vpop.eup %676 }
 0x1dc   :  { %v523_v40 = vmul.f32 %v677_v35, %v479_v21  ;;  %vm528_vm4 = vweird.f32 %v677_v35  ;;  %v515_v12 = vsel %vm514_vm5, %v675_v11, %v511_v52 }
 0x1dd   :  { %v679_v41 = vpop.eup %678  ;;  %vm529_vm7 = vmor %vm527_vm6, %vm528_vm4  ;;  %v520_v25 = vsel %vm517_vm9, %v519_v15, %v515_v12  ;;  %vm622_vm9 = vcmask 3072  }
 0x1de   :  { %v524_v46 = vsub.f32 1.0, %v523_v40  ;;  %v538_v47 = vmul.f32 %v679_v41, %v482_v29  ;;  %vm543_vm10 = vweird.f32 %v679_v41 }
 0x1df   :  { %vm544_vm12 = vmor %vm542_vm11, %vm543_vm10 }
 0x1e0   :  { %v525_v0 = vmul.f32 %v677_v35, %v524_v46  ;;  %v539_v6 = vsub.f32 1.0, %v538_v47 }
 0x1e2   :  { %v526_v8 = vadd.f32 %v677_v35, %v525_v0  ;;  %v540_v13 = vmul.f32 %v679_v41, %v539_v6 }
 0x1e4   :  { %v530_v16 = vsel %vm529_vm7, %v677_v35, %v526_v8  ;;  %v541_v31 = vadd.f32 %v679_v41, %v540_v13 }
 0x1e5   :  { %v535_v18 = vsel %vm532_vm8, %v534_v14, %v530_v16  ;;  %v500_v26 = vpop.xlane.xlu0 %499 }
 0x1e6   :  { %v536_v28 = vmul.f32 %v535_v18, %v503_v20  ;;  %v521_v30 = vmul.f32 %v520_v25, %v500_v26  ;;  %v545_v43 = vsel %vm544_vm12, %v679_v41, %v541_v31 }
 0x1e7   :  { %v550_v49 = vsel %vm547_vm13, %v549_v44, %v545_v43 }
 0x1e8   :  { %v555_v36 = vadd.f32 %v553_v19, %v536_v28  ;;  %v554_v37 = vadd.f32 %v553_v19, %v521_v30 }
 0x1ea   :  { %v560_v39 = vmul.f32 %v558_v32, %v555_v36  ;;  %v559_v42 = vmul.f32 %v558_v32, %v554_v37 }
 0x1ec   :  { %v632_v45 = vmul.f32 -1.442695, %v560_v39  ;;  %v631_v48 = vmul.f32 -1.442695, %v559_v42 }
 0x1ed   :  { %v506_v50 = vpop.xlane.xlu0 %505 }
 0x1ee   :  { %680 = vpow2.f32 %v632_v45  ;;  %v551_v51 = vmul.f32 %v550_v49, %v506_v50 }
 0x1ef   :  { %682 = vpow2.f32 %v631_v48 }
 0x1f0   :  { %v556_v53 = vadd.f32 %v553_v19, %v551_v51 }
 0x1f2   :  { %v561_v54 = vmul.f32 %v558_v32, %v556_v53 }
 0x1f4   :  { %v681_v55 = vpop.eup %680  ;;  %v633_v56 = vmul.f32 -1.442695, %v561_v54 }
 0x1f5   :  { %v683_v59 = vpop.eup %682  ;;  %v572_v60 = vadd.f32 1.0, %v681_v55 }
 0x1f6   :  { %v571_v61 = vadd.f32 1.0, %v683_v59  ;;  %684 = vpow2.f32 %v633_v56 }
 0x1f7   :  { %686 = vrcp.f32 %v572_v60  ;;  %v600_v4 = vand.u32 2147483648, %v572_v60  ;;  %v598_v10 = vand.u32 2147483647, %v572_v60  ;;  %vm594_vm0 = vweird.f32 %v572_v60 }
 0x1f8   :  { %688 = vrcp.f32 %v571_v61  ;;  %v585_v11 = vand.u32 2147483648, %v571_v61  ;;  %v583_v21 = vand.u32 2147483647, %v571_v61  ;;  %vm579_vm3 = vweird.f32 %v571_v61 }
 0x1f9   :  { %v601_v33 = vor.u32 1.1754944e-38, %v600_v4  ;;  %vm599_vm4 = vcmp.eq.f32.partialorder %v598_v10, 8.507059e+37 }
 0x1fa   :  { %v586_v41 = vor.u32 1.1754944e-38, %v585_v11  ;;  %vm584_vm6 = vcmp.eq.f32.partialorder %v583_v21, 8.507059e+37 }
 0x1fc   :  { %v685_v62 = vpop.eup %684 }
 0x1fd   :  { %v687_v1 = vpop.eup %686  ;;  %v573_v2 = vadd.f32 1.0, %v685_v62 }
 0x1fe   :  { %v689_v22 = vpop.eup %688  ;;  %v590_v23 = vmul.f32 %v687_v1, %v572_v60  ;;  %vm595_vm14 = vweird.f32 %v687_v1 }
 0x1ff   :  { %v575_v24 = vmul.f32 %v689_v22, %v571_v61  ;;  %690 = vrcp.f32 %v573_v2  ;;  %vm580_vm15 = vweird.f32 %v689_v22  ;;  %vm596_vm2 = vmor %vm594_vm0, %vm595_vm14  ;;  %v615_v63 = vand.u32 2147483648, %v573_v2 }
 0x200   :  { %v591_v3 = vsub.f32 1.0, %v590_v23  ;;  %vm581_vm5 = vmor %vm579_vm3, %vm580_vm15  ;;  %v613_v6 = vand.u32 2147483647, %v573_v2  ;;  %vm609_vm8 = vweird.f32 %v573_v2 }
 0x201   :  { %v576_v5 = vsub.f32 1.0, %v575_v24  ;;  %v616_v8 = vor.u32 1.1754944e-38, %v615_v63 }
 0x202   :  { %v592_v9 = vmul.f32 %v687_v1, %v591_v3  ;;  %vm614_vm11 = vcmp.eq.f32.partialorder %v613_v6, 8.507059e+37 }
 0x203   :  { %v577_v17 = vmul.f32 %v689_v22, %v576_v5 }
 0x204   :  { %v593_v27 = vadd.f32 %v687_v1, %v592_v9 }
 0x205   :  { %v691_v29 = vpop.eup %690  ;;  %v578_v35 = vadd.f32 %v689_v22, %v577_v17 }
 0x206   :  { %v597_v40 = vsel %vm596_vm2, %v687_v1, %v593_v27  ;;  %v605_v46 = vmul.f32 %v691_v29, %v573_v2  ;;  %vm610_vm7 = vweird.f32 %v691_v29 }
 0x207   :  { %v602_v47 = vsel %vm599_vm4, %v601_v33, %v597_v40  ;;  %v582_v52 = vsel %vm581_vm5, %v689_v22, %v578_v35  ;;  %vm611_vm10 = vmor %vm609_vm8, %vm610_vm7 }
 0x208   :  { %621 = vst.msk [vmem:[%s1026_s3 + $0x8] sm:$0xff] %vm619_vm1, %v602_v47  ;;  %v587_v57 = vsel %vm584_vm6, %v586_v41, %v582_v52  ;;  %v606_v58 = vsub.f32 1.0, %v605_v46 }
 0x209   :  { %620 = vst.msk [vmem:[%s1026_s3] sm:$0xff] %vm619_vm1, %v587_v57 }
 0x20a   :  { %v607_v0 = vmul.f32 %v691_v29, %v606_v58 }
 0x20c   :  { %v608_v7 = vadd.f32 %v691_v29, %v607_v0 }
 0x20e   :  { %v612_v12 = vsel %vm611_vm10, %v691_v29, %v608_v7 }
 0x20f   :  { %v617_v13 = vsel %vm614_vm11, %v616_v8, %v612_v12 }
 0x210   :  { %623 = vst.msk [vmem:[%s1026_s3 + $0x10] sm:$0xf] %vm622_vm9, %v617_v13 }
 0x211   :  { %628 = vsyncpa [#allocation3], 1 }

</bundles_post_ra>
